<compile_context>
chip_gen: v7x
topology: tpu7x:2x2x1
jax: 0.10.0
libtpu: 0.0.40
codegen_flags: <defaults>
</compile_context>

<pallas_src>
import jax
import jax.numpy as jnp
from jax.experimental import pallas as pl
from jax.experimental.pallas import tpu as pltpu

LOG_STD_MAX = 2.0
LOG_STD_MIN = -5.0


def actor_kernel(x_ref, w1_ref, w2_ref, wh_ref, b12_ref, bh_ref, out_ref):
    # Load inputs; cast activations to bf16 only at the MXU boundary.
    x = x_ref[...].astype(jnp.bfloat16)
    b12 = b12_ref[...]                                   # [2, 256] f32 (b1 row 0, b2 row 1)

    h1 = jnp.dot(x, w1_ref[...], preferred_element_type=jnp.float32) + b12[0:1, :]
    h1 = jnp.maximum(h1, 0.0)

    h2 = jnp.dot(h1.astype(jnp.bfloat16), w2_ref[...],
                 preferred_element_type=jnp.float32) + b12[1:2, :]
    h2 = jnp.maximum(h2, 0.0)

    # Single fused head matmul: columns [0, n_act) are mean, [n_act, 2*n_act) are
    # the log_std pre-activation.
    heads = jnp.dot(h2.astype(jnp.bfloat16), wh_ref[...],
                    preferred_element_type=jnp.float32) + bh_ref[...]

    n_act = out_ref.shape[1] // 2
    log_std = jnp.tanh(heads)
    log_std = LOG_STD_MIN + 0.5 * (LOG_STD_MAX - LOG_STD_MIN) * (log_std + 1.0)

    # Select per-lane: first half keeps the raw linear output (mean), second half
    # gets the tanh-clamped log_std. Keeps a single lane-contiguous store.
    lane = jax.lax.broadcasted_iota(jnp.int32, heads.shape, dimension=1)
    fused = jnp.where(lane < n_act, heads, log_std)

    out_ref[...] = fused.astype(out_ref.dtype)


def actor_forward(x, kparams):
    """x: [B, n_obs] f32. kparams: packed kernel params (see pack_params)."""
    B = x.shape[0]
    two_n_act = kparams["w_heads"].shape[1]
    n_act = two_n_act // 2
    vmem = pl.BlockSpec(memory_space=pltpu.MemorySpace.VMEM)

    fused = pl.pallas_call(
        actor_kernel,
        out_shape=jax.ShapeDtypeStruct((B, two_n_act), jnp.float32),
        in_specs=[vmem] * 6,
        out_specs=vmem,
    )(x,
      kparams["w1"], kparams["w2"], kparams["w_heads"],
      kparams["b12"], kparams["b_heads"])

    mean = fused[:, :n_act]
    log_std = fused[:, n_act:]
    return mean, log_std


def init_params_f32(key, n_obs, n_act, hidden=256):
    """PyTorch nn.Linear-style init (uniform(-1/sqrt(fan_in), +1/sqrt(fan_in))).

    Weights stored as [in, out] (transposed relative to nn.Linear.weight),
    biases as [1, out]. These are the f32 "master" weights.
    """
    ks = jax.random.split(key, 8)

    def linear(kw, kb, fan_in, fan_out):
        bound = 1.0 / float(fan_in) ** 0.5
        w = jax.random.uniform(kw, (fan_in, fan_out), jnp.float32, -bound, bound)
        b = jax.random.uniform(kb, (1, fan_out), jnp.float32, -bound, bound)
        return w, b

    w1, b1 = linear(ks[0], ks[1], n_obs, hidden)
    w2, b2 = linear(ks[2], ks[3], hidden, hidden)
    wm, bm = linear(ks[4], ks[5], hidden, n_act)
    wl, bl = linear(ks[6], ks[7], hidden, n_act)
    return dict(w1=w1, b1=b1, w2=w2, b2=b2, wm=wm, bm=bm, wl=wl, bl=bl)


def pack_params(p):
    """Pack f32 master params into the fused/bf16 layout the kernel expects."""
    return dict(
        w1=p["w1"].astype(jnp.bfloat16),                              # [n_obs, 256] bf16
        w2=p["w2"].astype(jnp.bfloat16),                              # [256, 256]   bf16
        w_heads=jnp.concatenate([p["wm"], p["wl"]], axis=1)
                   .astype(jnp.bfloat16),                             # [256, 2*n_act] bf16
        b12=jnp.concatenate([p["b1"], p["b2"]], axis=0),              # [2, 256] f32
        b_heads=jnp.concatenate([p["bm"], p["bl"]], axis=1),          # [1, 2*n_act] f32
    )


def actor_forward_ref_bf16(x, kp):
    """Reference that mirrors the kernel's bf16-operand / f32-accumulate math."""
    bf = jnp.bfloat16
    h1 = jnp.dot(x.astype(bf), kp["w1"], preferred_element_type=jnp.float32) + kp["b12"][0:1]
    h1 = jnp.maximum(h1, 0.0)
    h2 = jnp.dot(h1.astype(bf), kp["w2"], preferred_element_type=jnp.float32) + kp["b12"][1:2]
    h2 = jnp.maximum(h2, 0.0)
    heads = jnp.dot(h2.astype(bf), kp["w_heads"],
                    preferred_element_type=jnp.float32) + kp["b_heads"]
    n_act = heads.shape[1] // 2
    mean = heads[:, :n_act]
    log_std = jnp.tanh(heads[:, n_act:])
    log_std = LOG_STD_MIN + 0.5 * (LOG_STD_MAX - LOG_STD_MIN) * (log_std + 1.0)
    return mean, log_std


def actor_forward_ref_f32(x, p):
    """Pure f32 reference on the master weights (loose sanity check)."""
    h1 = jnp.maximum(x @ p["w1"] + p["b1"], 0.0)
    h2 = jnp.maximum(h1 @ p["w2"] + p["b2"], 0.0)
    mean = h2 @ p["wm"] + p["bm"]
    log_std = jnp.tanh(h2 @ p["wl"] + p["bl"])
    log_std = LOG_STD_MIN + 0.5 * (LOG_STD_MAX - LOG_STD_MIN) * (log_std + 1.0)
    return mean, log_std


if __name__ == "__main__":
    B, N_OBS, N_ACT = 2, 16, 4

    key = jax.random.PRNGKey(0)
    k_params, k_x = jax.random.split(key)
    params_f32 = init_params_f32(k_params, N_OBS, N_ACT)
    kparams = pack_params(params_f32)
    x = jax.random.normal(k_x, (B, N_OBS), dtype=jnp.float32)

    mean, log_std = actor_forward(x, kparams)
    jax.block_until_ready((mean, log_std))

    # Tight check against a reference doing the same bf16-operand math.
    mean_bf, log_std_bf = actor_forward_ref_bf16(x, kparams)
    assert jnp.allclose(mean, mean_bf, atol=2e-3, rtol=2e-3)
    assert jnp.allclose(log_std, log_std_bf, atol=2e-3, rtol=2e-3)

    # Loose sanity check against the full-f32 master-weight reference
    # (bf16 weight rounding introduces ~1e-2-level differences; expected).
    mean_f32, log_std_f32 = actor_forward_ref_f32(x, params_f32)
    assert jnp.allclose(mean, mean_f32, atol=1e-1, rtol=1e-1)
    assert jnp.allclose(log_std, log_std_f32, atol=1e-1, rtol=1e-1)

    assert mean.shape == (B, N_ACT) and log_std.shape == (B, N_ACT)
    assert float(jnp.min(log_std)) >= LOG_STD_MIN - 1e-3
    assert float(jnp.max(log_std)) <= LOG_STD_MAX + 1e-3

    print("KERNEL_OK")
</pallas_src>

<mosaic_0001>
module attributes {stable_mosaic.version = 11 : i64} {
  func.func @actor_kernel(%arg0: memref<2x16xf32, #tpu.memory_space<vmem>>, %arg1: memref<16x256xbf16, #tpu.memory_space<vmem>>, %arg2: memref<256x256xbf16, #tpu.memory_space<vmem>>, %arg3: memref<256x8xbf16, #tpu.memory_space<vmem>>, %arg4: memref<2x256xf32, #tpu.memory_space<vmem>>, %arg5: memref<1x8xf32, #tpu.memory_space<vmem>>, %arg6: memref<2x8xf32, #tpu.memory_space<vmem>>) attributes {dimension_semantics = [], scalar_prefetch = 0 : i64, scratch_operands = 0 : i64, tpu.core_type = #tpu.core_type<tc>} {
    %c0 = arith.constant 0 : index
    %c0_0 = arith.constant 0 : index
    %0 = vector.load %arg0[%c0, %c0_0] : memref<2x16xf32, #tpu.memory_space<vmem>>, vector<2x16xf32>
    %1 = arith.truncf %0 : vector<2x16xf32> to vector<2x16xbf16>
    %c0_1 = arith.constant 0 : index
    %c0_2 = arith.constant 0 : index
    %2 = vector.load %arg4[%c0_1, %c0_2] : memref<2x256xf32, #tpu.memory_space<vmem>>, vector<2x256xf32>
    %c0_3 = arith.constant 0 : index
    %c0_4 = arith.constant 0 : index
    %3 = vector.load %arg1[%c0_3, %c0_4] : memref<16x256xbf16, #tpu.memory_space<vmem>>, vector<16x256xbf16>
    %cst = arith.constant dense<0.000000e+00> : vector<2x256xf32>
    %4 = tpu.matmul %1, %3, %cst {dimension_numbers = #tpu.dot_dimension_numbers<[1], [0], [0], [1], [0, 0, 1, 1], [], []>} : vector<2x16xbf16>, vector<16x256xbf16>, vector<2x256xf32> -> vector<2x256xf32>
    %5 = vector.extract_strided_slice %2 {offsets = [0, 0], sizes = [1, 256], strides = [1, 1]} : vector<2x256xf32> to vector<1x256xf32>
    %6 = vector.broadcast %5 : vector<1x256xf32> to vector<2x256xf32>
    %7 = arith.addf %4, %6 : vector<2x256xf32>
    %cst_5 = arith.constant 0.000000e+00 : f32
    %8 = vector.broadcast %cst_5 : f32 to vector<2x256xf32>
    %9 = arith.maximumf %7, %8 : vector<2x256xf32>
    %10 = arith.truncf %9 : vector<2x256xf32> to vector<2x256xbf16>
    %c0_6 = arith.constant 0 : index
    %c0_7 = arith.constant 0 : index
    %11 = vector.load %arg2[%c0_6, %c0_7] : memref<256x256xbf16, #tpu.memory_space<vmem>>, vector<256x256xbf16>
    %cst_8 = arith.constant dense<0.000000e+00> : vector<2x256xf32>
    %12 = tpu.matmul %10, %11, %cst_8 {dimension_numbers = #tpu.dot_dimension_numbers<[1], [0], [0], [1], [0, 0, 1, 1], [], []>} : vector<2x256xbf16>, vector<256x256xbf16>, vector<2x256xf32> -> vector<2x256xf32>
    %13 = vector.extract_strided_slice %2 {offsets = [1, 0], sizes = [1, 256], strides = [1, 1]} : vector<2x256xf32> to vector<1x256xf32>
    %14 = vector.broadcast %13 : vector<1x256xf32> to vector<2x256xf32>
    %15 = arith.addf %12, %14 : vector<2x256xf32>
    %cst_9 = arith.constant 0.000000e+00 : f32
    %16 = vector.broadcast %cst_9 : f32 to vector<2x256xf32>
    %17 = arith.maximumf %15, %16 : vector<2x256xf32>
    %18 = arith.truncf %17 : vector<2x256xf32> to vector<2x256xbf16>
    %c0_10 = arith.constant 0 : index
    %c0_11 = arith.constant 0 : index
    %19 = vector.load %arg3[%c0_10, %c0_11] : memref<256x8xbf16, #tpu.memory_space<vmem>>, vector<256x8xbf16>
    %cst_12 = arith.constant dense<0.000000e+00> : vector<2x8xf32>
    %20 = tpu.matmul %18, %19, %cst_12 {dimension_numbers = #tpu.dot_dimension_numbers<[1], [0], [0], [1], [0, 0, 1, 1], [], []>} : vector<2x256xbf16>, vector<256x8xbf16>, vector<2x8xf32> -> vector<2x8xf32>
    %c0_13 = arith.constant 0 : index
    %c0_14 = arith.constant 0 : index
    %21 = vector.load %arg5[%c0_13, %c0_14] : memref<1x8xf32, #tpu.memory_space<vmem>>, vector<1x8xf32>
    %22 = vector.broadcast %21 : vector<1x8xf32> to vector<2x8xf32>
    %23 = arith.addf %20, %22 : vector<2x8xf32>
    %24 = math.tanh %23 : vector<2x8xf32>
    %cst_15 = arith.constant 1.000000e+00 : f32
    %25 = vector.broadcast %cst_15 : f32 to vector<2x8xf32>
    %26 = arith.addf %24, %25 : vector<2x8xf32>
    %cst_16 = arith.constant 3.500000e+00 : f32
    %27 = vector.broadcast %cst_16 : f32 to vector<2x8xf32>
    %28 = arith.mulf %27, %26 : vector<2x8xf32>
    %cst_17 = arith.constant -5.000000e+00 : f32
    %29 = vector.broadcast %cst_17 : f32 to vector<2x8xf32>
    %30 = arith.addf %29, %28 : vector<2x8xf32>
    %31 = tpu.iota {dimensions = array<i32: 1>} : vector<2x8xi32>
    %c4_i32 = arith.constant 4 : i32
    %32 = vector.broadcast %c4_i32 : i32 to vector<2x8xi32>
    %33 = arith.cmpi slt, %31, %32 : vector<2x8xi32>
    %34 = arith.select %33, %23, %30 : vector<2x8xi1>, vector<2x8xf32>
    %c0_18 = arith.constant 0 : index
    %c0_19 = arith.constant 0 : index
    %35 = vector.load %arg6[%c0_18, %c0_19] : memref<2x8xf32, #tpu.memory_space<vmem>>, vector<2x8xf32>
    tpu.vector_store %arg6[%c0_18, %c0_19], %34 {strides = array<i32>} : memref<2x8xf32, #tpu.memory_space<vmem>>, vector<2x8xf32>,
    return
  }
}

</mosaic_0001>

<bundles_post_ra>
// kernel: tpu_custom_call.1
= control target key start
LH: loop header
LB: loop body
LE: loop exit
PB: predicated region body
PF: predicated region fallthrough
CT: control target
= control target key end

     0   :  { %11 = vsyncpa [#allocation3], 0  ;;  %s900_s0 = inlined_call_operand.vmem [shape: f32[2,16], index: 0, kind: input, shape index: {}]   ;;  %s901_s1 = inlined_call_operand.vmem [shape: bf16[16,256], index: 1, kind: input, shape index: {}]   ;;  %s902_s2 = inlined_call_operand.hbm [shape: bf16[256,256], index: 2, kind: input, shape index: {}]   ;;  %s903_s3 = inlined_call_operand.vmem [shape: bf16[256,8], index: 3, kind: input, shape index: {}]   ;;  %s904_s4 = inlined_call_operand.vmem [shape: f32[2,256], index: 4, kind: input, shape index: {}]   ;;  %s905_s5 = inlined_call_operand.vmem [shape: f32[1,8], index: 5, kind: input, shape index: {}]   ;;  %s906_s6 = inlined_call_operand.hbm [shape: f32[2,8], index: 6, kind: output, shape index: {}]  }
   0x1   :  { %12 = vsyncpa [#allocation4], 0  ;;  %s773_s21 = smov [#allocation2]   ;;  %s725_s25 = scalar_lea.hbm %s902_s2, 4096 }
   0x2   :  { %s22_s22 = sshll.u32 %s773_s21, 4  ;;  %p726_p0 = scmp.ne.s32.totalorder %s902_s2, %s725_s25  ;;  %s23_s22 = int_to_ptr.vmem [resolvable:$true] %s22_s22 }
   0x3   :  { %p729_p1 = scmp.lt.u32.totalorder %s725_s25, %s902_s2 }
   0x5   :  { %p731_p2 = pnand %p729_p1, %p726_p0 }
   0x7   :  { %734 = shalt.err (!%p731_p2)
}
   0x8   :  { %s735_s30 = scalar_lea.vmem %s23_s22, 4096  ;;  %p740_p4 = scmp.lt.s32.totalorder %s23_s22, %s23_s22 }
   0x9   :  { %p736_p3 = scmp.ne.s32.totalorder %s23_s22, %s735_s30  ;;  %p741_p5 = scmp.lt.s32.totalorder %s735_s30, %s735_s30 }
   0xb   :  { %p742_p6 = por %p741_p5, %p740_p4 }
   0xd   :  { %p743_p7 = pnand %p742_p6, %p736_p3 }
   0xf   :  { %746 = shalt.err (!%p743_p7)
}
  0x10   :  { %s774_s7 = smov 128   ;;  %s775_s8 = smov 8  }
  0x11   :  { %28 = dma.hbm_to_vmem [thread:$0]  %s902_s2, 4096, %s23_s22, [#allocation3], %s774_s7, %s774_s7, %s775_s8  }
  0x12   :  { %769 = dma.done.wait [#allocation3], 4096  }
  0x13   :  { %770 = vsyncadd [#allocation3], 4294963200  ;;  %v776_v0 = vmov 0   ;;  %v656_v1 = vld [vmem:[%s901_s1 + $0x4] ss:$8 sps:$4 sm:$0xff]   ;;  %vm73_vm0 = vcmask 130048   ;;  %v45_v49 = vlaneseq }
  0x14   :  { %109 = vmatprep.mubr.bf16.mxu0 %v776_v0  ;;  %v658_v2 = vld [vmem:[%s901_s1] ss:$8 sps:$4 sm:$0xff]   ;;  %77 = vmatprep.subr.bf16.mxu0 %v656_v1  ;;  %v659_v5 = vld [vmem:[#allocation2 + $0x4] ss:$8 sps:$4 sm:$0xff]   ;;  %v662_v7 = vld [vmem:[#allocation2 + $0x14] ss:$8 sps:$4 sm:$0xff]  }
  0x15   :  { %v39_v3 = vld [vmem:[%s900_s0] sm:$0x3]  ;;  %78 = vmatpush1.bf16.msra.mxu0 %v658_v2  ;;  %332 = vmatprep.subr.bf16.mxu1 %v659_v5  ;;  %v664_v8 = vld [vmem:[#allocation2 + $0x10] ss:$8 sps:$4 sm:$0xff]   ;;  %v665_v9 = vld [vmem:[#allocation2 + $0x24] ss:$8 sps:$4 sm:$0xff]  }
  0x16   :  { %v40_v4 = vpack.c.bf16 %v39_v3, %v39_v3  ;;  %v661_v6 = vld [vmem:[#allocation2] ss:$8 sps:$4 sm:$0xff]   ;;  %v668_v11 = vld [vmem:[#allocation2 + $0x34] ss:$8 sps:$4 sm:$0xff]   ;;  %v670_v12 = vld [vmem:[#allocation2 + $0x30] ss:$8 sps:$4 sm:$0xff]  }
  0x17   :  { %333 = vmatpush1.bf16.msra.mxu1 %v661_v6  ;;  %v667_v10 = vld [vmem:[#allocation2 + $0x20] ss:$8 sps:$4 sm:$0xff]   ;;  %v671_v13 = vld [vmem:[#allocation2 + $0x44] ss:$8 sps:$4 sm:$0xff]   ;;  %v674_v15 = vld [vmem:[#allocation2 + $0x54] ss:$8 sps:$4 sm:$0xff]  }
  0x18   :  { %579 = vmatmul.mubr.msk.bf16.vlgmr.msra.gmra.mrb[0].mxu0 %vm73_vm0, %v40_v4  ;;  %334 = vmatprep.subr.bf16.mxu1 %v662_v7  ;;  %v673_v14 = vld [vmem:[#allocation2 + $0x40] ss:$8 sps:$4 sm:$0xff]   ;;  %v676_v16 = vld [vmem:[#allocation2 + $0x50] ss:$8 sps:$4 sm:$0xff]   ;;  %v677_v17 = vld [vmem:[#allocation2 + $0x64] ss:$8 sps:$4 sm:$0xff]  }
  0x19   :  { %v679_v18 = vld [vmem:[#allocation2 + $0x60] ss:$8 sps:$4 sm:$0xff]   ;;  %v680_v19 = vld [vmem:[#allocation2 + $0x74] ss:$8 sps:$4 sm:$0xff]   ;;  %v682_v20 = vld [vmem:[#allocation2 + $0x70] ss:$8 sps:$4 sm:$0xff]  }
  0x1a   :  { %v683_v21 = vld [vmem:[#allocation2 + $0x84] ss:$8 sps:$4 sm:$0xff]   ;;  %v685_v22 = vld [vmem:[#allocation2 + $0x80] ss:$8 sps:$4 sm:$0xff]   ;;  %v686_v23 = vld [vmem:[#allocation2 + $0x94] ss:$8 sps:$4 sm:$0xff]  }
  0x1b   :  { %335 = vmatpush1.bf16.msra.mxu1 %v664_v8  ;;  %v688_v24 = vld [vmem:[#allocation2 + $0x90] ss:$8 sps:$4 sm:$0xff]   ;;  %v689_v25 = vld [vmem:[#allocation2 + $0xa4] ss:$8 sps:$4 sm:$0xff]   ;;  %v691_v26 = vld [vmem:[#allocation2 + $0xa0] ss:$8 sps:$4 sm:$0xff]  }
  0x1c   :  { %336 = vmatprep.subr.bf16.mxu1 %v665_v9  ;;  %v692_v27 = vld [vmem:[#allocation2 + $0xb4] ss:$8 sps:$4 sm:$0xff]   ;;  %v694_v28 = vld [vmem:[#allocation2 + $0xb0] ss:$8 sps:$4 sm:$0xff]   ;;  %v695_v29 = vld [vmem:[#allocation2 + $0xc4] ss:$8 sps:$4 sm:$0xff]  }
  0x1d   :  { %v697_v30 = vld [vmem:[#allocation2 + $0xc0] ss:$8 sps:$4 sm:$0xff]   ;;  %v698_v31 = vld [vmem:[#allocation2 + $0xd4] ss:$8 sps:$4 sm:$0xff]   ;;  %v700_v32 = vld [vmem:[#allocation2 + $0xd0] ss:$8 sps:$4 sm:$0xff]  }
  0x1e   :  { %v701_v33 = vld [vmem:[#allocation2 + $0xe4] ss:$8 sps:$4 sm:$0xff]   ;;  %v703_v34 = vld [vmem:[#allocation2 + $0xe0] ss:$8 sps:$4 sm:$0xff]   ;;  %v704_v35 = vld [vmem:[#allocation2 + $0xf4] ss:$8 sps:$4 sm:$0xff]  }
  0x1f   :  { %337 = vmatpush1.bf16.msra.mxu1 %v667_v10  ;;  %v706_v36 = vld [vmem:[#allocation2 + $0xf0] ss:$8 sps:$4 sm:$0xff]   ;;  %v707_v37 = vld [vmem:[%s903_s3 + $0x40] sm:$0xff]   ;;  %v709_v39 = vld [vmem:[%s903_s3 + $0x48] sm:$0xff]   ;;  %v46_v50 = vshrl.u32 %v45_v49, 7  ;;  %s777_s21 = smov [#allocation5]  }
  0x20   :  { %338 = vmatprep.subr.bf16.mxu1 %v668_v11  ;;  %v708_v38 = vld [vmem:[%s903_s3] sm:$0xff]   ;;  %629 = vmatprep.subr.bf16.mxu0 %v707_v37  ;;  %v710_v40 = vld [vmem:[%s903_s3 + $0x8] sm:$0xff]   ;;  %v711_v41 = vld [vmem:[%s903_s3 + $0x50] sm:$0xff]   ;;  %s568_s22 = sshll.u32 %s777_s21, 4  ;;  %vm560_vm2 = vcmask 58368   ;;  %s569_s22 = int_to_ptr.vmem [resolvable:$true] %s568_s22 }
  0x21   :  { %630 = vmatpush3.bf16.msra.mxu0 %v708_v38  ;;  %v712_v42 = vld [vmem:[%s903_s3 + $0x10] sm:$0xff]   ;;  %v713_v43 = vld [vmem:[%s903_s3 + $0x58] sm:$0xff]   ;;  %v715_v45 = vld [vmem:[%s903_s3 + $0x60] sm:$0xff]   ;;  %v47_v51 = vsub.s32 0, %v46_v50  ;;  %v51_v53 = vsub.s32 2, %v46_v50  ;;  %v156_v8 = vsub.s32 1, %v46_v50  ;;  %p752_p9 = scmp.lt.s32.totalorder %s569_s22, %s569_s22 }
  0x22   :  { %631 = vmatprep.subr.bf16.mxu0 %v709_v39  ;;  %v714_v44 = vld [vmem:[%s903_s3 + $0x18] sm:$0xff]   ;;  %v716_v46 = vld [vmem:[%s903_s3 + $0x20] sm:$0xff]   ;;  %v717_v47 = vld [vmem:[%s903_s3 + $0x68] sm:$0xff]   ;;  %v160_v9 = vsub.s32 3, %v46_v50  ;;  %s747_s23 = scalar_lea.vmem %s569_s22, 32 }
  0x23   :  { %339 = vmatpush1.bf16.msra.mxu1 %v670_v12  ;;  %v718_v48 = vld [vmem:[%s903_s3 + $0x28] sm:$0xff]   ;;  %v41_v52 = vld [vmem:[%s904_s4] sm:$0xf]  ;;  %v719_v4 = vld [vmem:[%s903_s3 + $0x70] sm:$0xff]   ;;  %p748_p8 = scmp.ne.s32.totalorder %s569_s22, %s747_s23  ;;  %p753_p10 = scmp.lt.s32.totalorder %s747_s23, %s747_s23 }
  0x24   :  { %340 = vmatprep.subr.bf16.mxu1 %v671_v13  ;;  %v48_v54 = vrot.slane %v41_v52, %v47_v51  ;;  %v52_v55 = vrot.slane %v41_v52, %v51_v53  ;;  %v720_v5 = vld [vmem:[%s903_s3 + $0x30] sm:$0xff]   ;;  %v721_v6 = vld [vmem:[%s903_s3 + $0x78] sm:$0xff]   ;;  %v157_v10 = vrot.slane %v41_v52, %v156_v8  ;;  %v161_v11 = vrot.slane %v41_v52, %v160_v9 }
  0x25   :  { %632 = vmatpush3.bf16.msra.mxu0 %v710_v40  ;;  %v722_v7 = vld [vmem:[%s903_s3 + $0x38] sm:$0xff]   ;;  %p754_p11 = por %p753_p10, %p752_p9 }
  0x26   :  { %633 = vmatprep.subr.bf16.mxu0 %v711_v41  ;;  %v58_v56 = vrot.slane %v48_v54, %v47_v51  ;;  %v62_v57 = vrot.slane %v52_v55, %v47_v51  ;;  %v167_v12 = vrot.slane %v157_v10, %v156_v8  ;;  %v171_v13 = vrot.slane %v161_v11, %v156_v8 }
  0x27   :  { %341 = vmatpush1.bf16.msra.mxu1 %v673_v14  ;;  %p755_p12 = pnand %p754_p11, %p748_p8 }
  0x28   :  { %342 = vmatprep.subr.bf16.mxu1 %v674_v15 }
  0x29   :  { %634 = vmatpush3.bf16.msra.mxu0 %v712_v42 }
  0x2a   :  { %635 = vmatprep.subr.bf16.mxu0 %v713_v43 }
  0x2b   :  { %343 = vmatpush1.bf16.msra.mxu1 %v676_v16 }
  0x2c   :  { %344 = vmatprep.subr.bf16.mxu1 %v677_v17 }
  0x2d   :  { %636 = vmatpush3.bf16.msra.mxu0 %v714_v44 }
  0x2e   :  { %637 = vmatprep.subr.bf16.mxu0 %v715_v45 }
  0x2f   :  { %345 = vmatpush1.bf16.msra.mxu1 %v679_v18 }
  0x30   :  { %346 = vmatprep.subr.bf16.mxu1 %v680_v19 }
  0x31   :  { %638 = vmatpush3.bf16.msra.mxu0 %v716_v46 }
  0x32   :  { %639 = vmatprep.subr.bf16.mxu0 %v717_v47 }
  0x33   :  { %347 = vmatpush1.bf16.msra.mxu1 %v682_v20 }
  0x34   :  { %348 = vmatprep.subr.bf16.mxu1 %v683_v21 }
  0x35   :  { %640 = vmatpush3.bf16.msra.mxu0 %v718_v48 }
  0x36   :  { %641 = vmatprep.subr.bf16.mxu0 %v719_v4 }
  0x37   :  { %349 = vmatpush1.bf16.msra.mxu1 %v685_v22 }
  0x38   :  { %350 = vmatprep.subr.bf16.mxu1 %v686_v23 }
  0x39   :  { %642 = vmatpush3.bf16.msra.mxu0 %v720_v5 }
  0x3a   :  { %643 = vmatprep.subr.bf16.mxu0 %v721_v6 }
  0x3b   :  { %351 = vmatpush1.bf16.msra.mxu1 %v688_v24 }
  0x3c   :  { %352 = vmatprep.subr.bf16.mxu1 %v689_v25  ;;  %v612_v25 = vld [vmem:[%s905_s5] ss:$0 sm:$0xff] }
  0x3d   :  { %644 = vmatpush3.bf16.msra.mxu0 %v722_v7 }
  0x3f   :  { %353 = vmatpush1.bf16.msra.mxu1 %v691_v26 }
  0x40   :  { %354 = vmatprep.subr.bf16.mxu1 %v692_v27 }
  0x43   :  { %355 = vmatpush1.bf16.msra.mxu1 %v694_v28 }
  0x44   :  { %356 = vmatprep.subr.bf16.mxu1 %v695_v29 }
  0x47   :  { %357 = vmatpush1.bf16.msra.mxu1 %v697_v30 }
  0x48   :  { %358 = vmatprep.subr.bf16.mxu1 %v698_v31 }
  0x4b   :  { %359 = vmatpush1.bf16.msra.mxu1 %v700_v32  ;;  %v557_v32 = vand.u32 127, %v45_v49 }
  0x4c   :  { %360 = vmatprep.subr.bf16.mxu1 %v701_v33 }
  0x4d   :  { %vm558_vm1 = vcmp.lt.s32.totalorder %v557_v32, 4 }
  0x4f   :  { %361 = vmatpush1.bf16.msra.mxu1 %v703_v34 }
  0x50   :  { %362 = vmatprep.subr.bf16.mxu1 %v704_v35 }
  0x53   :  { %363 = vmatpush1.bf16.msra.mxu1 %v706_v36 }
  0xeb   :  { %v111_v58 = vpop.f32.mrb[0].mxu0 }
  0xec   :  { %v112_v59 = vadd.f32 %v111_v58, %v58_v56  ;;  %v113_v60 = vpop.f32.mrb[1].mxu0 }
  0xed   :  { %v114_v61 = vadd.f32 %v113_v60, %v62_v57  ;;  %v115_v62 = vpop.f32.mrb[2].mxu0 }
  0xee   :  { %v118_v63 = vmax.f32 %v112_v59, 0.0  ;;  %v116_v0 = vpop.f32.mrb[3].mxu0 }
  0xef   :  { %v119_v1 = vmax.f32 %v114_v61, 0.0 }
  0xf0   :  { %v120_v3 = vpack.c.bf16 %v118_v63, %v118_v63 }
  0xf1   :  { %v121_v2 = vpack.c.bf16 %v119_v1, %v119_v1 }
  0xf3   :  { %364 = vmatprep.mubr.bf16.mxu1 %v121_v2 }
  0xf4   :  { %365 = vmatmul.mubr.bf16.vlgmr.msra.gmra.mrb[0].mxu1 %v120_v3 }
 0x1c7   :  { %v366_v14 = vpop.f32.mrb[0].mxu1 }
 0x1c8   :  { %v367_v15 = vadd.f32 %v366_v14, %v167_v12  ;;  %v368_v16 = vpop.f32.mrb[1].mxu1 }
 0x1c9   :  { %v369_v17 = vadd.f32 %v368_v16, %v171_v13  ;;  %v370_v18 = vpop.f32.mrb[2].mxu1 }
 0x1ca   :  { %v373_v19 = vmax.f32 %v367_v15, 0.0  ;;  %v371_v20 = vpop.f32.mrb[3].mxu1 }
 0x1cb   :  { %v374_v21 = vmax.f32 %v369_v17, 0.0 }
 0x1cc   :  { %v375_v23 = vpack.c.bf16 %v373_v19, %v373_v19 }
 0x1cd   :  { %v376_v22 = vpack.c.bf16 %v374_v21, %v374_v21 }
 0x1cf   :  { %544 = vmatprep.mubr.bf16.mxu0 %v376_v22 }
 0x1d0   :  { %545 = vmatmul.mubr.bf16.vlgmr.msra.gmra.mrb[4].mxu0 %v375_v23 }
 0x2a3   :  { %v645_v24 = vpop.f32.mrb[4].mxu0 }
 0x2a4   :  { %v646_v26 = vpop.f32.mrb[5].mxu0 }
 0x2a5   :  { %v647_v27 = vadd.f32 %v646_v26, %v645_v24  ;;  %v648_v28 = vpop.f32.mrb[6].mxu0 }
 0x2a6   :  { %v649_v29 = vpop.f32.mrb[7].mxu0 }
 0x2a7   :  { %v547_v30 = vadd.f32 %v647_v27, %v612_v25 }
 0x2a9   :  { %723 = vtanh.f32 %v547_v30 }
 0x2b3   :  { %v724_v31 = vpop.eup %723 }
 0x2b4   :  { %v553_v33 = vadd.f32 1.0, %v724_v31 }
 0x2b6   :  { %v554_v34 = vmul.f32 3.5, %v553_v33 }
 0x2b8   :  { %v555_v35 = vadd.f32 -5.0, %v554_v34 }
 0x2ba   :  { %v559_v36 = vsel %vm558_vm1, %v547_v30, %v555_v35 }
 0x2bb   :  { %561 = vst.msk [vmem:[#allocation5] sm:$0x3] %vm560_vm2, %v559_v36 }
 0x2bc   :  { %758 = shalt.err (!%p755_p12)
}
 0x2bd   :  { %s759_s25 = scalar_lea.hbm %s906_s6, 32 }
 0x2be   :  { %p760_p13 = scmp.ne.s32.totalorder %s906_s6, %s759_s25  ;;  %p763_p0 = scmp.lt.u32.totalorder %s759_s25, %s906_s6 }
 0x2c0   :  { %p765_p1 = pnand %p763_p0, %p760_p13 }
 0x2c2   :  { %768 = shalt.err (!%p765_p1)
}
 0x2c3   :  { %571 = dma.vmem_to_hbm [thread:$0]  %s569_s22, 32, %s906_s6, [#allocation4]  }
 0x2c4   :  { %771 = dma.done.wait [#allocation4], 32  }
 0x2c5   :  { %772 = vsyncadd [#allocation4], 4294967264 }
 0x2c6   :  { %575 = vsyncpa [#allocation3], 1 }
 0x2c7   :  { %576 = vsyncpa [#allocation4], 1 }

</bundles_post_ra>
